<compile_context>
chip_gen: v5e
topology: v5e:2x2
jax: 0.10.0
libtpu: 0.0.40
codegen_flags: <defaults>
</compile_context>

<pallas_src>
import functools

import jax
import jax.numpy as jnp
import numpy as np
from jax.experimental import pallas as pl
from jax.experimental.pallas import tpu as pltpu


def _round_up(x, m):
    return (x + m - 1) // m * m


# ----------------------------- kernels -----------------------------

def _rel_pos_kernel_shared(q_ref, rel_ref, o_ref, s_ref, *, tokens, bh_tile):
    # q_ref: (bh_tile, T, D); rel_ref: (D, Wpad); o_ref: (bh_tile, T, T)
    # s_ref: (bh_tile*T, Wpad) f32 scratch
    t = tokens
    d = q_ref.shape[-1]
    w_pad = rel_ref.shape[-1]

    # One large MXU matmul for all bh_tile slices: S[m, r] = sum_d q2[m, d] * rel[d, r]
    q2 = q_ref[...].reshape(bh_tile * t, d)          # layout no-op when T % 8 == 0
    s_ref[...] = jnp.dot(q2, rel_ref[...], preferred_element_type=jnp.float32)

    # relative -> absolute skew: strided roll (XLU slot).
    # rolled[i, c] = S[i, (c + (T-1) - i) mod Wpad]; for c in [0, T) the index stays in
    # [0, 2T-2] so neither the zero padding nor wraparound ever leaks in, and the kept
    # columns start at lane 0 (lane-aligned store).
    shift = (w_pad - (t - 1)) % w_pad
    for g in range(bh_tile):                          # bounded static unroll
        s_g = s_ref[g * t:(g + 1) * t, :]
        rolled = pltpu.roll(s_g, shift, 1, stride=1, stride_axis=0)
        o_ref[g] = rolled[:, :t].astype(o_ref.dtype)


def _rel_pos_kernel_per_head(q_ref, rel_ref, o_ref, s_ref, *, tokens, b_tile):
    # q_ref: (b_tile, 1, T, D); rel_ref: (1, D, Wpad); o_ref: (b_tile, 1, T, T)
    t = tokens
    d = q_ref.shape[-1]
    w_pad = rel_ref.shape[-1]

    q2 = q_ref[...].reshape(b_tile * t, d)
    s_ref[...] = jnp.dot(q2, rel_ref[0], preferred_element_type=jnp.float32)

    shift = (w_pad - (t - 1)) % w_pad
    for g in range(b_tile):
        s_g = s_ref[g * t:(g + 1) * t, :]
        rolled = pltpu.roll(s_g, shift, 1, stride=1, stride_axis=0)
        o_ref[g, 0] = rolled[:, :t].astype(o_ref.dtype)


# ----------------------------- tiling ------------------------------

_VMEM_BUDGET = 12 * 1024 * 1024   # per-step footprint target (fits every gen's scoped VMEM)
_MAX_ROWS = 2048                  # matmul-M cap per step
_MAX_UNROLL = 32                  # static unroll / code-size bound


def _pick_tile(n, t, d, w_pad, in_itemsize, out_itemsize):
    """VMEM-budget-driven tile: bytes per (batch,head) slice = double-buffered q tile +
    double-buffered out tile + f32 matmul scratch (single-buffered)."""
    per = 2 * t * d * in_itemsize + 2 * t * t * out_itemsize + t * w_pad * 4
    cap = max(1, _VMEM_BUDGET // per)
    cap = min(cap, max(1, _MAX_ROWS // max(t, 1)), _MAX_UNROLL, n)
    return max(1, cap), per


def _vmem_limit(tile, per, d, w_pad, rel_itemsize):
    needed = tile * per + 2 * d * w_pad * rel_itemsize + (1 << 20)   # + slack
    return int(min(max(needed * 5 // 4, 16 << 20), 48 << 20))


# ----------------------------- wrappers -----------------------------

def _rel_pos_emb_shared(qf, rel_emb, *, mxu_dtype=None):
    """qf: [N, T, D] (N = flattened batch*heads); rel_emb: [2T-1, D] -> [N, T, T]."""
    n, t, d = qf.shape
    r = 2 * t - 1
    assert rel_emb.shape == (r, d), rel_emb.shape
    out_dtype = qf.dtype

    if mxu_dtype is not None:                     # optional bf16 operands (v5e knob)
        qf = qf.astype(mxu_dtype)
        rel_emb = rel_emb.astype(mxu_dtype)

    # Pre-transpose + zero-pad the embedding once (plain NN matmul in-kernel, lane-aligned roll).
    w_pad = _round_up(r, 128)
    rel_t = jnp.zeros((d, w_pad), rel_emb.dtype).at[:, :r].set(rel_emb.T)

    in_isz = jnp.dtype(qf.dtype).itemsize
    out_isz = jnp.dtype(out_dtype).itemsize
    bh_tile, per = _pick_tile(n, t, d, w_pad, in_isz, out_isz)

    n_pad = _round_up(n, bh_tile)
    if n_pad != n:
        qf = jnp.pad(qf, ((0, n_pad - n), (0, 0), (0, 0)))
    grid = (n_pad // bh_tile,)

    kernel = functools.partial(_rel_pos_kernel_shared, tokens=t, bh_tile=bh_tile)
    out = pl.pallas_call(
        kernel,
        out_shape=jax.ShapeDtypeStruct((n_pad, t, t), out_dtype),
        grid_spec=pltpu.PrefetchScalarGridSpec(
            num_scalar_prefetch=0,
            grid=grid,
            in_specs=[
                pl.BlockSpec((bh_tile, t, d), lambda i: (i, 0, 0)),
                pl.BlockSpec((d, w_pad), lambda i: (0, 0)),   # constant index: DMA'd once
            ],
            out_specs=pl.BlockSpec((bh_tile, t, t), lambda i: (i, 0, 0)),
            scratch_shapes=[pltpu.VMEM((bh_tile * t, w_pad), jnp.float32)],
        ),
        compiler_params=pltpu.CompilerParams(
            dimension_semantics=("parallel",),
            vmem_limit_bytes=_vmem_limit(bh_tile, per, d, w_pad,
                                         jnp.dtype(rel_t.dtype).itemsize),
        ),
    )(qf, rel_t)
    return out[:n] if n_pad != n else out


def _rel_pos_emb_per_head(q, rel_emb, *, mxu_dtype=None):
    """q: [B, H, T, D]; rel_emb: [H, 2T-1, D] -> [B, H, T, T] (single pallas_call)."""
    b, h, t, d = q.shape
    r = 2 * t - 1
    assert rel_emb.shape == (h, r, d), rel_emb.shape
    out_dtype = q.dtype

    if mxu_dtype is not None:
        q = q.astype(mxu_dtype)
        rel_emb = rel_emb.astype(mxu_dtype)

    w_pad = _round_up(r, 128)
    rel_t = jnp.zeros((h, d, w_pad), rel_emb.dtype).at[:, :, :r].set(
        jnp.swapaxes(rel_emb, -1, -2))

    in_isz = jnp.dtype(q.dtype).itemsize
    out_isz = jnp.dtype(out_dtype).itemsize
    b_tile, per = _pick_tile(b, t, d, w_pad, in_isz, out_isz)

    b_pad = _round_up(b, b_tile)
    if b_pad != b:
        q = jnp.pad(q, ((0, b_pad - b), (0, 0), (0, 0), (0, 0)))
    grid = (h, b_pad // b_tile)   # head-outer: rel tile only changes with h

    kernel = functools.partial(_rel_pos_kernel_per_head, tokens=t, b_tile=b_tile)
    out = pl.pallas_call(
        kernel,
        out_shape=jax.ShapeDtypeStruct((b_pad, h, t, t), out_dtype),
        grid_spec=pltpu.PrefetchScalarGridSpec(
            num_scalar_prefetch=0,
            grid=grid,
            in_specs=[
                pl.BlockSpec((b_tile, 1, t, d), lambda hh, i: (i, hh, 0, 0)),
                pl.BlockSpec((1, d, w_pad), lambda hh, i: (hh, 0, 0)),
            ],
            out_specs=pl.BlockSpec((b_tile, 1, t, t), lambda hh, i: (i, hh, 0, 0)),
            scratch_shapes=[pltpu.VMEM((b_tile * t, w_pad), jnp.float32)],
        ),
        compiler_params=pltpu.CompilerParams(
            dimension_semantics=("parallel", "parallel"),
            vmem_limit_bytes=_vmem_limit(b_tile, per, d, w_pad,
                                         jnp.dtype(rel_t.dtype).itemsize),
        ),
    )(q, rel_t)
    return out[:b] if b_pad != b else out


def rel_pos_emb_1d(q, rel_emb, shared_heads=None, *, mxu_dtype=None):
    """q: [B, H, T, D]; rel_emb: [2T-1, D] (shared) or [H, 2T-1, D] (per-head).

    Note on numerics: the in-kernel matmul uses the default MXU precision (bf16 passes,
    f32 accumulation) for f32 operands, the same as a default-precision jnp.einsum.
    Pass mxu_dtype=jnp.bfloat16 to also cast the operands (halves read traffic; v5e knob).
    """
    b, h, t, d = q.shape
    if shared_heads is None:
        shared_heads = rel_emb.ndim == 2
    if shared_heads:
        out = _rel_pos_emb_shared(q.reshape(b * h, t, d), rel_emb, mxu_dtype=mxu_dtype)
        return out.reshape(b, h, t, t)
    return _rel_pos_emb_per_head(q, rel_emb, mxu_dtype=mxu_dtype)


class RelPosEmb1D:
    """JAX/Pallas port of the PyTorch RelPosEmb1D.

    Mirrors the PyTorch __init__ quirk: shared_heads = heads if heads is not None else
    True, so any truthy `heads` still selects the shared [2T-1, D] parameter/path.
    """

    def __init__(self, tokens, dim_head, key, heads=None):
        scale = dim_head ** (-0.5)
        self.tokens = tokens
        self.shared_heads = heads if heads is not None else True
        if self.shared_heads:
            shape = (2 * tokens - 1, dim_head)
        else:
            shape = (heads, 2 * tokens - 1, dim_head)
        self.rel_pos_emb = jax.random.normal(key, shape, jnp.float32) * scale

    def __call__(self, q):
        return rel_pos_emb_1d(q, self.rel_pos_emb, self.shared_heads)


# ---------- plain-JAX reference mirroring the PyTorch code (validation) ----------
def _relative_to_absolute_ref(emb):
    b, h, l, _ = emb.shape
    x = jnp.pad(emb, ((0, 0), (0, 0), (0, 0), (0, 1)))          # col_pad
    flat = x.reshape(b, h, l * 2 * l)                           # 'b h l c -> b h (l c)'
    flat = jnp.pad(flat, ((0, 0), (0, 0), (0, l - 1)))          # flat_pad
    final = flat.reshape(b, h, l + 1, 2 * l - 1)
    return final[:, :, :l, l - 1:]


def _ref_forward_shared(q, rel_emb):
    emb = jnp.einsum('bhtd,rd->bhtr', q, rel_emb)
    return _relative_to_absolute_ref(emb)


def _ref_forward_per_head(q, rel_emb):
    emb = jnp.einsum('bhtd,hrd->bhtr', q, rel_emb)
    return _relative_to_absolute_ref(emb)


if __name__ == "__main__":
    key = jax.random.PRNGKey(0)
    k_q, k_emb, k_emb3 = jax.random.split(key, 3)

    batch, heads, tokens, dim_head = 2, 4, 8, 32
    q = jax.random.normal(k_q, (batch, heads, tokens, dim_head), jnp.float32)

    # Shared-heads path (what the nn.Module exercises).
    module = RelPosEmb1D(tokens, dim_head, k_emb, heads=heads)
    out = jax.block_until_ready(module(q))
    assert out.shape == (batch, heads, tokens, tokens)
    ref = _ref_forward_shared(q, module.rel_pos_emb)
    np.testing.assert_allclose(np.asarray(out), np.asarray(ref), rtol=2e-2, atol=2e-2)

    # Per-head path of the functional API (rel_emb: [H, 2T-1, D]).
    rel3 = jax.random.normal(k_emb3, (heads, 2 * tokens - 1, dim_head),
                             jnp.float32) * dim_head ** (-0.5)
    out3 = jax.block_until_ready(rel_pos_emb_1d(q, rel3, shared_heads=False))
    ref3 = _ref_forward_per_head(q, rel3)
    np.testing.assert_allclose(np.asarray(out3), np.asarray(ref3), rtol=2e-2, atol=2e-2)

    print("KERNEL_OK")
</pallas_src>

<mosaic_0001>
module attributes {stable_mosaic.version = 11 : i64} {
  func.func @_rel_pos_kernel_shared(%arg0: i32, %arg1: memref<8x8x32xf32, #tpu.memory_space<vmem>>, %arg2: memref<32x128xf32, #tpu.memory_space<vmem>>, %arg3: memref<8x8x8xf32, #tpu.memory_space<vmem>>, %arg4: memref<64x128xf32, #tpu.memory_space<vmem>>) attributes {dimension_semantics = [#tpu.dimension_semantics<parallel>], iteration_bounds = array<i64: 1>, scalar_prefetch = 0 : i64, scratch_operands = 1 : i64, tpu.core_type = #tpu.core_type<tc>, window_params = [{transform_indices = @transform_0, window_bounds = array<i64: 8, 8, 32>}, {pipeline_mode = #tpu.pipeline_mode<synchronous>, transform_indices = @transform_1, window_bounds = array<i64: 32, 128>}, {transform_indices = @transform_2, window_bounds = array<i64: 8, 8, 8>}]} {
    %c0 = arith.constant 0 : index
    %c0_0 = arith.constant 0 : index
    %c0_1 = arith.constant 0 : index
    %0 = vector.load %arg1[%c0, %c0_0, %c0_1] : memref<8x8x32xf32, #tpu.memory_space<vmem>>, vector<8x8x32xf32>
    %1 = vector.shape_cast %0 : vector<8x8x32xf32> to vector<64x32xf32>
    %c0_2 = arith.constant 0 : index
    %c0_3 = arith.constant 0 : index
    %2 = vector.load %arg2[%c0_2, %c0_3] : memref<32x128xf32, #tpu.memory_space<vmem>>, vector<32x128xf32>
    %cst = arith.constant dense<0.000000e+00> : vector<64x128xf32>
    %3 = tpu.matmul %1, %2, %cst {dimension_numbers = #tpu.dot_dimension_numbers<[1], [0], [0], [1], [0, 0, 1, 1], [], []>} : vector<64x32xf32>, vector<32x128xf32>, vector<64x128xf32> -> vector<64x128xf32>
    %c0_4 = arith.constant 0 : index
    %c0_5 = arith.constant 0 : index
    %4 = vector.load %arg4[%c0_4, %c0_5] : memref<64x128xf32, #tpu.memory_space<vmem>>, vector<64x128xf32>
    tpu.vector_store %arg4[%c0_4, %c0_5], %3 {strides = array<i32>} : memref<64x128xf32, #tpu.memory_space<vmem>>, vector<64x128xf32>,
    %c0_6 = arith.constant 0 : index
    %c0_7 = arith.constant 0 : index
    %5 = vector.load %arg4[%c0_6, %c0_7] : memref<64x128xf32, #tpu.memory_space<vmem>>, vector<8x128xf32>
    %c121_i32 = arith.constant 121 : i32
    %6 = tpu.dynamic_rotate %5 by %c121_i32 dim 1 {stride = 1 : si32, stride_dimension = 0 : si32} : vector<8x128xf32>, i32 -> vector<8x128xf32>
    %7 = vector.extract_strided_slice %6 {offsets = [0, 0], sizes = [8, 8], strides = [1, 1]} : vector<8x128xf32> to vector<8x8xf32>
    %c0_8 = arith.constant 0 : index
    %c0_9 = arith.constant 0 : index
    %c0_10 = arith.constant 0 : index
    %8 = vector.load %arg3[%c0_8, %c0_9, %c0_10] : memref<8x8x8xf32, #tpu.memory_space<vmem>>, vector<1x8x8xf32>
    %9 = vector.shape_cast %8 : vector<1x8x8xf32> to vector<8x8xf32>
    %10 = vector.shape_cast %7 : vector<8x8xf32> to vector<1x8x8xf32>
    tpu.vector_store %arg3[%c0_8, %c0_9, %c0_10], %10 {strides = array<i32>} : memref<8x8x8xf32, #tpu.memory_space<vmem>>, vector<1x8x8xf32>,
    %c8 = arith.constant 8 : index
    %c0_11 = arith.constant 0 : index
    %11 = vector.load %arg4[%c8, %c0_11] : memref<64x128xf32, #tpu.memory_space<vmem>>, vector<8x128xf32>
    %c121_i32_12 = arith.constant 121 : i32
    %12 = tpu.dynamic_rotate %11 by %c121_i32_12 dim 1 {stride = 1 : si32, stride_dimension = 0 : si32} : vector<8x128xf32>, i32 -> vector<8x128xf32>
    %13 = vector.extract_strided_slice %12 {offsets = [0, 0], sizes = [8, 8], strides = [1, 1]} : vector<8x128xf32> to vector<8x8xf32>
    %c1 = arith.constant 1 : index
    %c0_13 = arith.constant 0 : index
    %c0_14 = arith.constant 0 : index
    %14 = vector.load %arg3[%c1, %c0_13, %c0_14] : memref<8x8x8xf32, #tpu.memory_space<vmem>>, vector<1x8x8xf32>
    %15 = vector.shape_cast %14 : vector<1x8x8xf32> to vector<8x8xf32>
    %16 = vector.shape_cast %13 : vector<8x8xf32> to vector<1x8x8xf32>
    tpu.vector_store %arg3[%c1, %c0_13, %c0_14], %16 {strides = array<i32>} : memref<8x8x8xf32, #tpu.memory_space<vmem>>, vector<1x8x8xf32>,
    %c16 = arith.constant 16 : index
    %c0_15 = arith.constant 0 : index
    %17 = vector.load %arg4[%c16, %c0_15] : memref<64x128xf32, #tpu.memory_space<vmem>>, vector<8x128xf32>
    %c121_i32_16 = arith.constant 121 : i32
    %18 = tpu.dynamic_rotate %17 by %c121_i32_16 dim 1 {stride = 1 : si32, stride_dimension = 0 : si32} : vector<8x128xf32>, i32 -> vector<8x128xf32>
    %19 = vector.extract_strided_slice %18 {offsets = [0, 0], sizes = [8, 8], strides = [1, 1]} : vector<8x128xf32> to vector<8x8xf32>
    %c2 = arith.constant 2 : index
    %c0_17 = arith.constant 0 : index
    %c0_18 = arith.constant 0 : index
    %20 = vector.load %arg3[%c2, %c0_17, %c0_18] : memref<8x8x8xf32, #tpu.memory_space<vmem>>, vector<1x8x8xf32>
    %21 = vector.shape_cast %20 : vector<1x8x8xf32> to vector<8x8xf32>
    %22 = vector.shape_cast %19 : vector<8x8xf32> to vector<1x8x8xf32>
    tpu.vector_store %arg3[%c2, %c0_17, %c0_18], %22 {strides = array<i32>} : memref<8x8x8xf32, #tpu.memory_space<vmem>>, vector<1x8x8xf32>,
    %c24 = arith.constant 24 : index
    %c0_19 = arith.constant 0 : index
    %23 = vector.load %arg4[%c24, %c0_19] : memref<64x128xf32, #tpu.memory_space<vmem>>, vector<8x128xf32>
    %c121_i32_20 = arith.constant 121 : i32
    %24 = tpu.dynamic_rotate %23 by %c121_i32_20 dim 1 {stride = 1 : si32, stride_dimension = 0 : si32} : vector<8x128xf32>, i32 -> vector<8x128xf32>
    %25 = vector.extract_strided_slice %24 {offsets = [0, 0], sizes = [8, 8], strides = [1, 1]} : vector<8x128xf32> to vector<8x8xf32>
    %c3 = arith.constant 3 : index
    %c0_21 = arith.constant 0 : index
    %c0_22 = arith.constant 0 : index
    %26 = vector.load %arg3[%c3, %c0_21, %c0_22] : memref<8x8x8xf32, #tpu.memory_space<vmem>>, vector<1x8x8xf32>
    %27 = vector.shape_cast %26 : vector<1x8x8xf32> to vector<8x8xf32>
    %28 = vector.shape_cast %25 : vector<8x8xf32> to vector<1x8x8xf32>
    tpu.vector_store %arg3[%c3, %c0_21, %c0_22], %28 {strides = array<i32>} : memref<8x8x8xf32, #tpu.memory_space<vmem>>, vector<1x8x8xf32>,
    %c32 = arith.constant 32 : index
    %c0_23 = arith.constant 0 : index
    %29 = vector.load %arg4[%c32, %c0_23] : memref<64x128xf32, #tpu.memory_space<vmem>>, vector<8x128xf32>
    %c121_i32_24 = arith.constant 121 : i32
    %30 = tpu.dynamic_rotate %29 by %c121_i32_24 dim 1 {stride = 1 : si32, stride_dimension = 0 : si32} : vector<8x128xf32>, i32 -> vector<8x128xf32>
    %31 = vector.extract_strided_slice %30 {offsets = [0, 0], sizes = [8, 8], strides = [1, 1]} : vector<8x128xf32> to vector<8x8xf32>
    %c4 = arith.constant 4 : index
    %c0_25 = arith.constant 0 : index
    %c0_26 = arith.constant 0 : index
    %32 = vector.load %arg3[%c4, %c0_25, %c0_26] : memref<8x8x8xf32, #tpu.memory_space<vmem>>, vector<1x8x8xf32>
    %33 = vector.shape_cast %32 : vector<1x8x8xf32> to vector<8x8xf32>
    %34 = vector.shape_cast %31 : vector<8x8xf32> to vector<1x8x8xf32>
    tpu.vector_store %arg3[%c4, %c0_25, %c0_26], %34 {strides = array<i32>} : memref<8x8x8xf32, #tpu.memory_space<vmem>>, vector<1x8x8xf32>,
    %c40 = arith.constant 40 : index
    %c0_27 = arith.constant 0 : index
    %35 = vector.load %arg4[%c40, %c0_27] : memref<64x128xf32, #tpu.memory_space<vmem>>, vector<8x128xf32>
    %c121_i32_28 = arith.constant 121 : i32
    %36 = tpu.dynamic_rotate %35 by %c121_i32_28 dim 1 {stride = 1 : si32, stride_dimension = 0 : si32} : vector<8x128xf32>, i32 -> vector<8x128xf32>
    %37 = vector.extract_strided_slice %36 {offsets = [0, 0], sizes = [8, 8], strides = [1, 1]} : vector<8x128xf32> to vector<8x8xf32>
    %c5 = arith.constant 5 : index
    %c0_29 = arith.constant 0 : index
    %c0_30 = arith.constant 0 : index
    %38 = vector.load %arg3[%c5, %c0_29, %c0_30] : memref<8x8x8xf32, #tpu.memory_space<vmem>>, vector<1x8x8xf32>
    %39 = vector.shape_cast %38 : vector<1x8x8xf32> to vector<8x8xf32>
    %40 = vector.shape_cast %37 : vector<8x8xf32> to vector<1x8x8xf32>
    tpu.vector_store %arg3[%c5, %c0_29, %c0_30], %40 {strides = array<i32>} : memref<8x8x8xf32, #tpu.memory_space<vmem>>, vector<1x8x8xf32>,
    %c48 = arith.constant 48 : index
    %c0_31 = arith.constant 0 : index
    %41 = vector.load %arg4[%c48, %c0_31] : memref<64x128xf32, #tpu.memory_space<vmem>>, vector<8x128xf32>
    %c121_i32_32 = arith.constant 121 : i32
    %42 = tpu.dynamic_rotate %41 by %c121_i32_32 dim 1 {stride = 1 : si32, stride_dimension = 0 : si32} : vector<8x128xf32>, i32 -> vector<8x128xf32>
    %43 = vector.extract_strided_slice %42 {offsets = [0, 0], sizes = [8, 8], strides = [1, 1]} : vector<8x128xf32> to vector<8x8xf32>
    %c6 = arith.constant 6 : index
    %c0_33 = arith.constant 0 : index
    %c0_34 = arith.constant 0 : index
    %44 = vector.load %arg3[%c6, %c0_33, %c0_34] : memref<8x8x8xf32, #tpu.memory_space<vmem>>, vector<1x8x8xf32>
    %45 = vector.shape_cast %44 : vector<1x8x8xf32> to vector<8x8xf32>
    %46 = vector.shape_cast %43 : vector<8x8xf32> to vector<1x8x8xf32>
    tpu.vector_store %arg3[%c6, %c0_33, %c0_34], %46 {strides = array<i32>} : memref<8x8x8xf32, #tpu.memory_space<vmem>>, vector<1x8x8xf32>,
    %c56 = arith.constant 56 : index
    %c0_35 = arith.constant 0 : index
    %47 = vector.load %arg4[%c56, %c0_35] : memref<64x128xf32, #tpu.memory_space<vmem>>, vector<8x128xf32>
    %c121_i32_36 = arith.constant 121 : i32
    %48 = tpu.dynamic_rotate %47 by %c121_i32_36 dim 1 {stride = 1 : si32, stride_dimension = 0 : si32} : vector<8x128xf32>, i32 -> vector<8x128xf32>
    %49 = vector.extract_strided_slice %48 {offsets = [0, 0], sizes = [8, 8], strides = [1, 1]} : vector<8x128xf32> to vector<8x8xf32>
    %c7 = arith.constant 7 : index
    %c0_37 = arith.constant 0 : index
    %c0_38 = arith.constant 0 : index
    %50 = vector.load %arg3[%c7, %c0_37, %c0_38] : memref<8x8x8xf32, #tpu.memory_space<vmem>>, vector<1x8x8xf32>
    %51 = vector.shape_cast %50 : vector<1x8x8xf32> to vector<8x8xf32>
    %52 = vector.shape_cast %49 : vector<8x8xf32> to vector<1x8x8xf32>
    tpu.vector_store %arg3[%c7, %c0_37, %c0_38], %52 {strides = array<i32>} : memref<8x8x8xf32, #tpu.memory_space<vmem>>, vector<1x8x8xf32>,
    return
  }
  func.func @transform_0(%arg0: i32) -> (i32, i32, i32) {
    %c0_i32 = arith.constant 0 : i32
    %c0_i32_0 = arith.constant 0 : i32
    %c0_i32_1 = arith.constant 0 : i32
    return %arg0, %c0_i32, %c0_i32_0 : i32, i32, i32
  }
  func.func @transform_1(%arg0: i32) -> (i32, i32) {
    %c0_i32 = arith.constant 0 : i32
    %c0_i32_0 = arith.constant 0 : i32
    %c0_i32_1 = arith.constant 0 : i32
    return %c0_i32, %c0_i32_0 : i32, i32
  }
  func.func @transform_2(%arg0: i32) -> (i32, i32, i32) {
    %c0_i32 = arith.constant 0 : i32
    %c0_i32_0 = arith.constant 0 : i32
    %c0_i32_1 = arith.constant 0 : i32
    return %arg0, %c0_i32, %c0_i32_0 : i32, i32, i32
  }
}

</mosaic_0001>

<bundles_post_ra>
// kernel: tpu_custom_call.1
= control target key start
LH: loop header
LB: loop body
LE: loop exit
PB: predicated region body
PF: predicated region fallthrough
CT: control target
= control target key end

     0   :  { %7 = vsyncpa [#allocation4], 0  ;;  %s365_s0 = inlined_call_operand.hbm [shape: f32[8,8,32], index: 0, kind: input, shape index: {}]   ;;  %s366_s1 = inlined_call_operand.hbm [shape: f32[32,128], index: 1, kind: input, shape index: {}]   ;;  %s367_s2 = inlined_call_operand.hbm [shape: f32[8,8,8], index: 2, kind: output, shape index: {}]  }
   0x1   :  { %8 = vsyncpa [#allocation7], 0 }
   0x2   :  { %9 = vsyncpa [#allocation5], 0  ;;  %s14_s11 = sshll.u32 %s365_s0, 4  ;;  %s310_s12 = smov [#allocation3]   ;;  %s15_s11 = int_to_ptr.hbm [resolvable:$true] %s14_s11 }
   0x3   :  { %s16_s13 = sshll.u32 %s310_s12, 4  ;;  %s27_s16 = sshll.u32 %s366_s1, 4  ;;  %s17_s13 = int_to_ptr.vmem [resolvable:$true] %s16_s13  ;;  %s28_s16 = int_to_ptr.hbm [resolvable:$true] %s27_s16 }
   0x4   :  { %s311_s17 = smov 128   ;;  %s312_s18 = smov 8  }
   0x5   :  { %22 = dma.hbm_to_vmem [thread:$0]  %s15_s11, 1024, %s17_s13, [#allocation4], %s311_s17, %s311_s17, %s312_s18  }
   0x6   :  { %s313_s19 = smov [#allocation6]  }
   0x7   :  { %s29_s20 = sshll.u32 %s313_s19, 4  ;;  %s30_s20 = int_to_ptr.vmem [resolvable:$true] %s29_s20 }
   0x8   :  { %35 = dma.hbm_to_vmem [thread:$0]  %s28_s16, 512, %s30_s20, [#allocation7], %s311_s17, %s311_s17, %s312_s18  }
   0x9   :  { %304 = dma.done.wait [#allocation4], 1024  }
   0xa   :  { %305 = vsyncadd [#allocation4], 4294966272 }
   0xb   :  { %306 = dma.done.wait [#allocation7], 512  }
   0xc   :  { %307 = vsyncadd [#allocation7], 4294966784  ;;  %v55_v0 = vld [vmem:[#allocation6 + $0x18] sm:$0xff]  ;;  %v54_v1 = vld [vmem:[#allocation6 + $0x10] sm:$0xff]  ;;  %vm56_vm0 = vcmask 261120   ;;  %s314_s0 = smov 377  }
   0xd   :  { %93 = vmatpush.msra.mxu0 %v55_v0  ;;  %214 = vmatpush.msra.mxu1 %v55_v0  ;;  %v53_v2 = vld [vmem:[#allocation6 + $0x8] sm:$0xff]  ;;  %v52_v3 = vld [vmem:[#allocation6] sm:$0xff]  ;;  %v46_v5 = vld [vmem:[#allocation3 + $0x10] sm:$0xff]  ;;  %vm135_vm1 = vcmask 64512   ;;  %s315_s1 = smov [#allocation8]   ;;  %s192_s24 = sshll.u32 %s367_s2, 4  ;;  %s193_s24 = int_to_ptr.hbm [resolvable:$true] %s192_s24 }
   0xe   :  { %216 = vmatpush.msra.mxu3 %v55_v0  ;;  %215 = vmatpush.msra.mxu2 %v55_v0  ;;  %v44_v4 = vld [vmem:[#allocation3] sm:$0xff]  ;;  %v50_v6 = vld [vmem:[#allocation3 + $0x30] sm:$0xff]  ;;  %v45_v8 = vld [vmem:[#allocation3 + $0x8] sm:$0xff]  ;;  %s190_s21 = sshll.u32 %s315_s1, 4  ;;  %s191_s21 = int_to_ptr.vmem [resolvable:$true] %s190_s21 }
   0xf   :  { %94 = vmatpush.msra.mxu0 %v54_v1  ;;  %217 = vmatpush.msra.mxu1 %v54_v1  ;;  %v48_v7 = vld [vmem:[#allocation3 + $0x20] sm:$0xff]  ;;  %v47_v9 = vld [vmem:[#allocation3 + $0x18] sm:$0xff]  ;;  %v49_v11 = vld [vmem:[#allocation3 + $0x28] sm:$0xff] }
  0x10   :  { %219 = vmatpush.msra.mxu3 %v54_v1  ;;  %218 = vmatpush.msra.mxu2 %v54_v1  ;;  %v51_v10 = vld [vmem:[#allocation3 + $0x38] sm:$0xff] }
  0x11   :  { %95 = vmatpush.msra.mxu0 %v53_v2  ;;  %220 = vmatpush.msra.mxu1 %v53_v2 }
  0x12   :  { %222 = vmatpush.msra.mxu3 %v53_v2  ;;  %221 = vmatpush.msra.mxu2 %v53_v2 }
  0x13   :  { %96 = vmatpush.msra.mxu0 %v52_v3  ;;  %223 = vmatpush.msra.mxu1 %v52_v3 }
  0x14   :  { %206 = vmatmul.msk.f32.vlgmr.msra.gmra.mxu0 %vm56_vm0, %v44_v4  ;;  %208 = vmatmul.msk.f32.vlgmr.msra.gmra.mxu1 %vm56_vm0, %v46_v5 }
  0x15   :  { %225 = vmatpush.msra.mxu3 %v52_v3  ;;  %224 = vmatpush.msra.mxu2 %v52_v3 }
  0x16   :  { %212 = vmatmul.msk.f32.vlgmr.msra.gmra.mxu3 %vm56_vm0, %v50_v6  ;;  %210 = vmatmul.msk.f32.vlgmr.msra.gmra.mxu2 %vm56_vm0, %v48_v7 }
  0x1c   :  { %207 = vmatmul.msk.f32.gmra.mxu0 %vm56_vm0, %v45_v8  ;;  %209 = vmatmul.msk.f32.gmra.mxu1 %vm56_vm0, %v47_v9 }
  0x1e   :  { %213 = vmatmul.msk.f32.gmra.mxu3 %vm56_vm0, %v51_v10  ;;  %211 = vmatmul.msk.f32.gmra.mxu2 %vm56_vm0, %v49_v11 }
  0x91   :  { %v98_v12 = vpop.f32.mrf.mxu0  ;;  %v104_v13 = vpop.f32.mrf.mxu1 }
  0x92   :  { %147 = vrot.lane.b32.xlu1 %v104_v13, %s314_s0  ;;  %133 = vrot.lane.b32.xlu0 %v98_v12, %s314_s0 }
  0x99   :  { %v101_v14 = vpop.f32.mrf.mxu0  ;;  %v107_v15 = vpop.f32.mrf.mxu1 }
  0x9a   :  { %v116_v16 = vpop.f32.mrf.mxu3  ;;  %154 = vrot.lane.b32.xlu1 %v107_v15, %s314_s0  ;;  %140 = vrot.lane.b32.xlu0 %v101_v14, %s314_s0  ;;  %v110_v17 = vpop.f32.mrf.mxu2 }
  0x9b   :  { %161 = vrot.lane.b32.xlu2 %v110_v17, %s314_s0 }
  0xa2   :  { %v119_v18 = vpop.f32.mrf.mxu3  ;;  %175 = vrot.lane.b32.xlu0 %v116_v16, %s314_s0  ;;  %v113_v19 = vpop.f32.mrf.mxu2 }
  0xa3   :  { %182 = vrot.lane.b32.xlu1 %v119_v18, %s314_s0  ;;  %168 = vrot.lane.b32.xlu2 %v113_v19, %s314_s0 }
  0xf5   :  { %v162_v20 = vpop.permute.xlu2 %161 }
  0xf6   :  { %164 = vst.msk [vmem:[#allocation8 + $0x20] sm:$0xff] %vm135_vm1, %v162_v20 }
  0xfd   :  { %v169_v21 = vpop.permute.xlu2 %168 }
  0xfe   :  { %171 = vst.msk [vmem:[#allocation8 + $0x28] sm:$0xff] %vm135_vm1, %v169_v21 }
 0x104   :  { %v148_v22 = vpop.permute.xlu1 %147  ;;  %v134_v23 = vpop.permute.xlu0 %133 }
 0x105   :  { %150 = vst.msk [vmem:[#allocation8 + $0x10] sm:$0xff] %vm135_vm1, %v148_v22 }
 0x106   :  { %136 = vst.msk [vmem:[#allocation8] sm:$0xff] %vm135_vm1, %v134_v23 }
 0x10c   :  { %v155_v24 = vpop.permute.xlu1 %154  ;;  %v141_v25 = vpop.permute.xlu0 %140 }
 0x10d   :  { %157 = vst.msk [vmem:[#allocation8 + $0x18] sm:$0xff] %vm135_vm1, %v155_v24 }
 0x10e   :  { %143 = vst.msk [vmem:[#allocation8 + $0x8] sm:$0xff] %vm135_vm1, %v141_v25 }
 0x114   :  { %v176_v26 = vpop.permute.xlu0 %175 }
 0x115   :  { %v183_v27 = vpop.permute.xlu1 %182  ;;  %178 = vst.msk [vmem:[#allocation8 + $0x30] sm:$0xff] %vm135_vm1, %v176_v26 }
 0x116   :  { %185 = vst.msk [vmem:[#allocation8 + $0x38] sm:$0xff] %vm135_vm1, %v183_v27 }
 0x117   :  { %198 = dma.vmem_to_hbm [thread:$0]  %s191_s21, 1024, %s193_s24, [#allocation5], %s311_s17, %s311_s17, %s312_s18  }
 0x118   :  { %308 = dma.done.wait [#allocation5], 1024  }
 0x119   :  { %309 = vsyncadd [#allocation5], 4294966272 }
 0x11a   :  { %203 = vsyncpa [#allocation4], 1 }
 0x11b   :  { %204 = vsyncpa [#allocation7], 1 }
 0x11c   :  { %205 = vsyncpa [#allocation5], 1 }

</bundles_post_ra>
